<compile_context>
chip_gen: v5e
topology: v5e:2x2
jax: 0.10.0
libtpu: 0.0.40
codegen_flags: <defaults>
</compile_context>

<pallas_src>
import jax
import jax.numpy as jnp
from jax.experimental import pallas as pl
from jax.experimental.pallas import tpu as pltpu


def _round_up(x, m):
    return (x + m - 1) // m * m


def _im2col_channel_major(x_bf16, ks):
    """x: [N, Cin, D, H, W] -> patches [N, Cin*ks^3, Do*Ho*Wo] (K order c, kd, kh, kw)."""
    N, C, D, H, W = x_bf16.shape
    Do, Ho, Wo = D - ks + 1, H - ks + 1, W - ks + 1
    cols = []
    for kd in range(ks):
        for kh in range(ks):
            for kw in range(ks):
                cols.append(x_bf16[:, :, kd:kd + Do, kh:kh + Ho, kw:kw + Wo])
    patches = jnp.stack(cols, axis=2)                       # [N, C, ks^3, Do, Ho, Wo]
    return patches.reshape(N, C * ks ** 3, Do * Ho * Wo), (Do, Ho, Wo)


# ---------------------------------------------------------------------------
# Pass 1: conv-as-GEMM (bf16 MXU inputs, f32 accumulation) + per-tile BN partials.
# Zero-padded K rows / M columns contribute exactly 0 to the sums -> no masking.
# ---------------------------------------------------------------------------
def _conv_stats_kernel(p_ref, w_ref, y_ref, sum_ref, ssq_ref):
    y = jnp.dot(w_ref[...], p_ref[0], preferred_element_type=jnp.float32)  # (Cout, TM)
    y_ref[0] = y
    sum_ref[0, 0] = jnp.sum(y, axis=1, keepdims=True)        # (Cout, 1)
    ssq_ref[0, 0] = jnp.sum(y * y, axis=1, keepdims=True)    # (Cout, 1)


# ---------------------------------------------------------------------------
# Pass 2: fused batch-norm affine + ReLU (per-channel scale/shift pre-folded).
# ---------------------------------------------------------------------------
def _bn_relu_kernel(y_ref, scale_ref, shift_ref, o_ref):
    o_ref[0] = jnp.maximum(y_ref[0] * scale_ref[...] + shift_ref[...], 0.0)


def basic_convolution_block(x, weight, bias, gamma, beta, *, ks=3, eps=1e-5,
                            tile_m=2048):
    """x: [N, Cin, D, H, W]; weight: [Cout, Cin, ks, ks, ks]; returns NCDHW f32.

    stride=1 / padding=0 / dilation=1 (module defaults). The conv bias cancels
    exactly under the train-mode BatchNorm that follows, so it is accepted for
    API parity but not applied (add it back if eval-mode / running stats are used).
    """
    del bias
    N, Cin, _, _, _ = x.shape
    Cout = weight.shape[0]

    # bf16 before im2col: halves the bytes of the largest XLA intermediate.
    patches, (Do, Ho, Wo) = _im2col_channel_major(x.astype(jnp.bfloat16), ks)
    _, K, Mo = patches.shape
    Kp = _round_up(K, 128)

    # M tile: as large as a double-buffered bf16 patch slab allows (budgeted),
    # but keep the total grid >= 2 steps so v7x's two TensorCores both get work.
    vmem_budget = 24 * 1024 * 1024
    tm_cap = max(128, (vmem_budget // (4 * Kp)) // 128 * 128)
    TM = min(tile_m, tm_cap, _round_up(Mo, 128))
    if N * (-(-Mo // TM)) < 2 and Mo > 128:
        TM = _round_up(-(-Mo // 2), 128)
    Mop = _round_up(Mo, TM)
    n_tiles = Mop // TM

    p_pad = jnp.pad(patches, ((0, 0), (0, Kp - K), (0, Mop - Mo)))
    w_pad = jnp.pad(weight.reshape(Cout, Cin * ks ** 3).astype(jnp.bfloat16),
                    ((0, 0), (0, Kp - K)))

    cparams = pltpu.CompilerParams(
        dimension_semantics=("parallel", "parallel"),   # megacore over (n, m-tile)
        vmem_limit_bytes=32 * 1024 * 1024)              # safe on v7x's 64 MiB VMEM

    cost1 = pl.CostEstimate(
        flops=2 * N * Cout * Kp * Mop, transcendentals=0,
        bytes_accessed=(N * Kp * Mop * 2 + Cout * Kp * 2
                        + N * Cout * Mop * 4 + 2 * N * n_tiles * Cout * 4))

    y_conv, ssum, sssq = pl.pallas_call(
        _conv_stats_kernel,
        grid=(N, n_tiles),
        in_specs=[
            pl.BlockSpec((1, Kp, TM), lambda n, j: (n, 0, j)),      # streamed patches
            pl.BlockSpec((Cout, Kp), lambda n, j: (0, 0)),          # resident weights
        ],
        out_specs=[
            pl.BlockSpec((1, Cout, TM), lambda n, j: (n, 0, j)),    # conv output (NC[M])
            pl.BlockSpec((1, 1, Cout, 1), lambda n, j: (n, j, 0, 0)),
            pl.BlockSpec((1, 1, Cout, 1), lambda n, j: (n, j, 0, 0)),
        ],
        out_shape=[
            jax.ShapeDtypeStruct((N, Cout, Mop), jnp.float32),
            jax.ShapeDtypeStruct((N, n_tiles, Cout, 1), jnp.float32),
            jax.ShapeDtypeStruct((N, n_tiles, Cout, 1), jnp.float32),
        ],
        compiler_params=cparams,
        cost_estimate=cost1,
    )(p_pad, w_pad)

    # Combine exact per-tile partials into BatchNorm3d train-mode (biased) stats,
    # then fold gamma * rsqrt(var + eps) into one per-channel scale/shift.
    # (E[y^2]-E[y]^2 in f32 is cancellation-prone for huge M with |mean|>>std;
    #  switch to centered per-tile sums if tolerances ever tighten.)
    count = N * Mo
    ch_sum = jnp.sum(ssum, axis=(0, 1))[:, 0]                 # (Cout,)
    ch_ssq = jnp.sum(sssq, axis=(0, 1))[:, 0]
    mean = ch_sum / count
    var = jnp.maximum(ch_ssq / count - mean * mean, 0.0)
    inv_std = jax.lax.rsqrt(var + eps)
    g = gamma.astype(jnp.float32) * inv_std
    scale = g[:, None]                                        # (Cout, 1)
    shift = (beta.astype(jnp.float32) - mean * g)[:, None]    # (Cout, 1)

    cost2 = pl.CostEstimate(
        flops=3 * N * Cout * Mop, transcendentals=0,
        bytes_accessed=2 * N * Cout * Mop * 4 + 2 * Cout * 4)

    out_pad = pl.pallas_call(
        _bn_relu_kernel,
        grid=(N, n_tiles),
        in_specs=[
            pl.BlockSpec((1, Cout, TM), lambda n, j: (n, 0, j)),
            pl.BlockSpec((Cout, 1), lambda n, j: (0, 0)),
            pl.BlockSpec((Cout, 1), lambda n, j: (0, 0)),
        ],
        out_specs=pl.BlockSpec((1, Cout, TM), lambda n, j: (n, 0, j)),
        out_shape=jax.ShapeDtypeStruct((N, Cout, Mop), jnp.float32),
        input_output_aliases={0: 0},                          # reuse y_conv's buffer
        compiler_params=cparams,
        cost_estimate=cost2,
    )(y_conv, scale, shift)

    # Channel-major kernel layout is already NCDHW: just trim M padding + reshape.
    return out_pad[:, :, :Mo].reshape(N, Cout, Do, Ho, Wo)


def _reference(x, weight, bias, gamma, beta, eps=1e-5):
    """Plain-JAX reference: Conv3d (bf16 inputs, f32 accum) + BatchNorm3d(train) + ReLU."""
    y = jax.lax.conv_general_dilated(
        x.astype(jnp.bfloat16), weight.astype(jnp.bfloat16),
        window_strides=(1, 1, 1), padding="VALID",
        dimension_numbers=("NCDHW", "OIDHW", "NCDHW"),
        preferred_element_type=jnp.float32)
    y = y + bias[None, :, None, None, None]
    mean = jnp.mean(y, axis=(0, 2, 3, 4), keepdims=True)
    var = jnp.mean((y - mean) ** 2, axis=(0, 2, 3, 4), keepdims=True)
    y = (y - mean) / jnp.sqrt(var + eps)
    y = y * gamma[None, :, None, None, None] + beta[None, :, None, None, None]
    return jnp.maximum(y, 0.0)


if __name__ == "__main__":
    # Small shapes consistent with the module: N=2, Cin=4, Cout=8, spatial=8, ks=3.
    N, Cin, Cout, S, ks = 2, 4, 8, 8, 3

    key = jax.random.PRNGKey(0)
    kx, kw, kb = jax.random.split(key, 3)

    x = jax.random.normal(kx, (N, Cin, S, S, S), jnp.float32)
    fan_in = Cin * ks * ks * ks
    weight = jax.random.normal(kw, (Cout, Cin, ks, ks, ks), jnp.float32) * (fan_in ** -0.5)
    bias = jax.random.normal(kb, (Cout,), jnp.float32) * 0.1
    gamma = jnp.ones((Cout,), jnp.float32)    # BatchNorm3d default affine init
    beta = jnp.zeros((Cout,), jnp.float32)

    out = jax.jit(basic_convolution_block)(x, weight, bias, gamma, beta)
    out = jax.block_until_ready(out)

    ref = _reference(x, weight, bias, gamma, beta)
    assert out.shape == ref.shape == (N, Cout, S - ks + 1, S - ks + 1, S - ks + 1)
    max_err = float(jnp.max(jnp.abs(out - ref)))
    assert jnp.allclose(out, ref, rtol=2e-3, atol=2e-3), max_err

    print("KERNEL_OK")
</pallas_src>

<mosaic_0001>
module attributes {stable_mosaic.version = 11 : i64} {
  func.func @_conv_stats_kernel(%arg0: i32, %arg1: i32, %arg2: memref<1x128x256xbf16, #tpu.memory_space<vmem>>, %arg3: memref<8x128xbf16, #tpu.memory_space<vmem>>, %arg4: memref<1x8x256xf32, #tpu.memory_space<vmem>>, %arg5: memref<1x1x8x1xf32, #tpu.memory_space<vmem>>, %arg6: memref<1x1x8x1xf32, #tpu.memory_space<vmem>>) attributes {dimension_semantics = [#tpu.dimension_semantics<parallel>, #tpu.dimension_semantics<parallel>], iteration_bounds = array<i64: 2, 1>, scalar_prefetch = 0 : i64, scratch_operands = 0 : i64, tpu.core_type = #tpu.core_type<tc>, window_params = [{transform_indices = @transform_0, window_bounds = array<i64: 1, 128, 256>}, {pipeline_mode = #tpu.pipeline_mode<synchronous>, transform_indices = @transform_1, window_bounds = array<i64: 8, 128>}, {transform_indices = @transform_2, window_bounds = array<i64: 1, 8, 256>}, {transform_indices = @transform_3, window_bounds = array<i64: 1, 1, 8, 1>}, {transform_indices = @transform_4, window_bounds = array<i64: 1, 1, 8, 1>}]} {
    %c0 = arith.constant 0 : index
    %c0_0 = arith.constant 0 : index
    %0 = vector.load %arg3[%c0, %c0_0] : memref<8x128xbf16, #tpu.memory_space<vmem>>, vector<8x128xbf16>
    %c0_1 = arith.constant 0 : index
    %c0_2 = arith.constant 0 : index
    %c0_3 = arith.constant 0 : index
    %1 = vector.load %arg2[%c0_1, %c0_2, %c0_3] : memref<1x128x256xbf16, #tpu.memory_space<vmem>>, vector<1x128x256xbf16>
    %2 = vector.shape_cast %1 : vector<1x128x256xbf16> to vector<128x256xbf16>
    %cst = arith.constant dense<0.000000e+00> : vector<8x256xf32>
    %3 = tpu.matmul %0, %2, %cst {dimension_numbers = #tpu.dot_dimension_numbers<[1], [0], [0], [1], [0, 0, 1, 1], [], []>} : vector<8x128xbf16>, vector<128x256xbf16>, vector<8x256xf32> -> vector<8x256xf32>
    %c0_4 = arith.constant 0 : index
    %c0_5 = arith.constant 0 : index
    %c0_6 = arith.constant 0 : index
    %4 = vector.load %arg4[%c0_4, %c0_5, %c0_6] : memref<1x8x256xf32, #tpu.memory_space<vmem>>, vector<1x8x256xf32>
    %5 = vector.shape_cast %4 : vector<1x8x256xf32> to vector<8x256xf32>
    %6 = vector.shape_cast %3 : vector<8x256xf32> to vector<1x8x256xf32>
    tpu.vector_store %arg4[%c0_4, %c0_5, %c0_6], %6 {strides = array<i32>} : memref<1x8x256xf32, #tpu.memory_space<vmem>>, vector<1x8x256xf32>,
    %cst_7 = arith.constant dense<0.000000e+00> : vector<8xf32>
    %7 = vector.multi_reduction <add>, %3, %cst_7 [1] : vector<8x256xf32> to vector<8xf32>
    %8 = vector.shape_cast %7 : vector<8xf32> to vector<8x1xf32>
    %c0_8 = arith.constant 0 : index
    %c0_9 = arith.constant 0 : index
    %c0_10 = arith.constant 0 : index
    %c0_11 = arith.constant 0 : index
    %9 = vector.load %arg5[%c0_8, %c0_9, %c0_10, %c0_11] : memref<1x1x8x1xf32, #tpu.memory_space<vmem>>, vector<1x1x8x1xf32>
    %10 = vector.shape_cast %9 : vector<1x1x8x1xf32> to vector<8x1xf32>
    %11 = vector.shape_cast %8 : vector<8x1xf32> to vector<1x1x8x1xf32>
    tpu.vector_store %arg5[%c0_8, %c0_9, %c0_10, %c0_11], %11 {strides = array<i32>} : memref<1x1x8x1xf32, #tpu.memory_space<vmem>>, vector<1x1x8x1xf32>,
    %12 = arith.mulf %3, %3 : vector<8x256xf32>
    %cst_12 = arith.constant dense<0.000000e+00> : vector<8xf32>
    %13 = vector.multi_reduction <add>, %12, %cst_12 [1] : vector<8x256xf32> to vector<8xf32>
    %14 = vector.shape_cast %13 : vector<8xf32> to vector<8x1xf32>
    %c0_13 = arith.constant 0 : index
    %c0_14 = arith.constant 0 : index
    %c0_15 = arith.constant 0 : index
    %c0_16 = arith.constant 0 : index
    %15 = vector.load %arg6[%c0_13, %c0_14, %c0_15, %c0_16] : memref<1x1x8x1xf32, #tpu.memory_space<vmem>>, vector<1x1x8x1xf32>
    %16 = vector.shape_cast %15 : vector<1x1x8x1xf32> to vector<8x1xf32>
    %17 = vector.shape_cast %14 : vector<8x1xf32> to vector<1x1x8x1xf32>
    tpu.vector_store %arg6[%c0_13, %c0_14, %c0_15, %c0_16], %17 {strides = array<i32>} : memref<1x1x8x1xf32, #tpu.memory_space<vmem>>, vector<1x1x8x1xf32>,
    return
  }
  func.func @transform_0(%arg0: i32, %arg1: i32) -> (i32, i32, i32) {
    %c0_i32 = arith.constant 0 : i32
    %c0_i32_0 = arith.constant 0 : i32
    return %arg0, %c0_i32, %arg1 : i32, i32, i32
  }
  func.func @transform_1(%arg0: i32, %arg1: i32) -> (i32, i32) {
    %c0_i32 = arith.constant 0 : i32
    %c0_i32_0 = arith.constant 0 : i32
    %c0_i32_1 = arith.constant 0 : i32
    return %c0_i32, %c0_i32_0 : i32, i32
  }
  func.func @transform_2(%arg0: i32, %arg1: i32) -> (i32, i32, i32) {
    %c0_i32 = arith.constant 0 : i32
    %c0_i32_0 = arith.constant 0 : i32
    return %arg0, %c0_i32, %arg1 : i32, i32, i32
  }
  func.func @transform_3(%arg0: i32, %arg1: i32) -> (i32, i32, i32, i32) {
    %c0_i32 = arith.constant 0 : i32
    %c0_i32_0 = arith.constant 0 : i32
    %c0_i32_1 = arith.constant 0 : i32
    return %arg0, %arg1, %c0_i32, %c0_i32_0 : i32, i32, i32, i32
  }
  func.func @transform_4(%arg0: i32, %arg1: i32) -> (i32, i32, i32, i32) {
    %c0_i32 = arith.constant 0 : i32
    %c0_i32_0 = arith.constant 0 : i32
    %c0_i32_1 = arith.constant 0 : i32
    return %arg0, %arg1, %c0_i32, %c0_i32_0 : i32, i32, i32, i32
  }
}

module attributes {stable_mosaic.version = 11 : i64} {
  func.func @_bn_relu_kernel(%arg0: i32, %arg1: i32, %arg2: memref<1x8x256xf32, #tpu.memory_space<vmem>>, %arg3: memref<8x1xf32, #tpu.memory_space<vmem>>, %arg4: memref<8x1xf32, #tpu.memory_space<vmem>>, %arg5: memref<1x8x256xf32, #tpu.memory_space<vmem>>) attributes {dimension_semantics = [#tpu.dimension_semantics<parallel>, #tpu.dimension_semantics<parallel>], iteration_bounds = array<i64: 2, 1>, scalar_prefetch = 0 : i64, scratch_operands = 0 : i64, tpu.core_type = #tpu.core_type<tc>, window_params = [{transform_indices = @transform_0, window_bounds = array<i64: 1, 8, 256>}, {pipeline_mode = #tpu.pipeline_mode<synchronous>, transform_indices = @transform_1, window_bounds = array<i64: 8, 1>}, {pipeline_mode = #tpu.pipeline_mode<synchronous>, transform_indices = @transform_2, window_bounds = array<i64: 8, 1>}, {transform_indices = @transform_3, window_bounds = array<i64: 1, 8, 256>}]} {
    %c0 = arith.constant 0 : index
    %c0_0 = arith.constant 0 : index
    %c0_1 = arith.constant 0 : index
    %0 = vector.load %arg2[%c0, %c0_0, %c0_1] : memref<1x8x256xf32, #tpu.memory_space<vmem>>, vector<1x8x256xf32>
    %1 = vector.shape_cast %0 : vector<1x8x256xf32> to vector<8x256xf32>
    %c0_2 = arith.constant 0 : index
    %c0_3 = arith.constant 0 : index
    %2 = vector.load %arg3[%c0_2, %c0_3] : memref<8x1xf32, #tpu.memory_space<vmem>>, vector<8x1xf32>
    %3 = vector.broadcast %2 : vector<8x1xf32> to vector<8x256xf32>
    %4 = arith.mulf %1, %3 : vector<8x256xf32>
    %c0_4 = arith.constant 0 : index
    %c0_5 = arith.constant 0 : index
    %5 = vector.load %arg4[%c0_4, %c0_5] : memref<8x1xf32, #tpu.memory_space<vmem>>, vector<8x1xf32>
    %6 = vector.broadcast %5 : vector<8x1xf32> to vector<8x256xf32>
    %7 = arith.addf %4, %6 : vector<8x256xf32>
    %cst = arith.constant 0.000000e+00 : f32
    %8 = vector.broadcast %cst : f32 to vector<8x256xf32>
    %9 = arith.maximumf %7, %8 : vector<8x256xf32>
    %c0_6 = arith.constant 0 : index
    %c0_7 = arith.constant 0 : index
    %c0_8 = arith.constant 0 : index
    %10 = vector.load %arg5[%c0_6, %c0_7, %c0_8] : memref<1x8x256xf32, #tpu.memory_space<vmem>>, vector<1x8x256xf32>
    %11 = vector.shape_cast %10 : vector<1x8x256xf32> to vector<8x256xf32>
    %12 = vector.shape_cast %9 : vector<8x256xf32> to vector<1x8x256xf32>
    tpu.vector_store %arg5[%c0_6, %c0_7, %c0_8], %12 {strides = array<i32>} : memref<1x8x256xf32, #tpu.memory_space<vmem>>, vector<1x8x256xf32>,
    return
  }
  func.func @transform_0(%arg0: i32, %arg1: i32) -> (i32, i32, i32) {
    %c0_i32 = arith.constant 0 : i32
    %c0_i32_0 = arith.constant 0 : i32
    return %arg0, %c0_i32, %arg1 : i32, i32, i32
  }
  func.func @transform_1(%arg0: i32, %arg1: i32) -> (i32, i32) {
    %c0_i32 = arith.constant 0 : i32
    %c0_i32_0 = arith.constant 0 : i32
    %c0_i32_1 = arith.constant 0 : i32
    return %c0_i32, %c0_i32_0 : i32, i32
  }
  func.func @transform_2(%arg0: i32, %arg1: i32) -> (i32, i32) {
    %c0_i32 = arith.constant 0 : i32
    %c0_i32_0 = arith.constant 0 : i32
    %c0_i32_1 = arith.constant 0 : i32
    return %c0_i32, %c0_i32_0 : i32, i32
  }
  func.func @transform_3(%arg0: i32, %arg1: i32) -> (i32, i32, i32) {
    %c0_i32 = arith.constant 0 : i32
    %c0_i32_0 = arith.constant 0 : i32
    return %arg0, %c0_i32, %arg1 : i32, i32, i32
  }
}

</mosaic_0001>

<bundles_post_ra>
// kernel: basic_convolution_block.3
= control target key start
LH: loop header
LB: loop body
LE: loop exit
PB: predicated region body
PF: predicated region fallthrough
CT: control target
= control target key end

     0   :  { %s403_s12 = smov 0   ;;  %s405_s13 = smov 0   ;;  %s442_s0 = inlined_call_operand.vmem [shape: f32[2,8,256], index: 0, kind: input, shape index: {}, may-alias: {0,3}]   ;;  %s443_s1 = inlined_call_operand.vmem [shape: f32[8,1], index: 1, kind: input, shape index: {}]   ;;  %s444_s2 = inlined_call_operand.vmem [shape: f32[8,1], index: 2, kind: input, shape index: {}]   ;;  %s445_s3 = inlined_call_operand.vmem [shape: f32[2,8,256], index: 3, kind: output, shape index: {}, may-alias: {0,3}]  }
   0x1   :  { %s407_s14 = smov 0  }
   0x2 LB: > { %s25_s15 = sadd.s32 1, %s376_s13  ;;  %p323_p0 = scmp.ge.s32.totalorder %s380_s14, 1  ;;  %s380_s14 = sphi %s407_s14, %s13_s14   ;;  %s376_s13 = sphi %s405_s13, %s447_s13   ;;  %s372_s12 = sphi %s403_s12, %s446_s12  }
   0x3   : > { %p27_p1 = scmp.ge.s32.totalorder %s25_s15, 2  ;;  %p158_p2 = scmp.lt.s32.totalorder %s380_s14, 3 }
   0x5   : > { %s449_s15 = smov (%p27_p1, %s25_s15), 0  ;;  %p159_p3 = pnand %p323_p0, %p158_p2 }
   0x6   : > { %p191_p4 = scmp.lt.s32.totalorder (!%p159_p3), %s372_s12, 1 }
   0x7   : > { %162 = sbr.rel (%p159_p3) target bundleno = 143 (0x8f), region = 32 }
   0xc   : > { %v212_v0 = vld [vmem:[%s443_s1] sm:$0xff]  ;;  %v382_v1 = vmov 0   ;;  %s451_s12 = smov (!%p191_p4, %s372_s12), 1 }
   0xd   : > { %357 = vset.pattern.permute.xlu0 %v382_v1  ;;  %v220_v2 = vld [vmem:[%s444_s2] sm:$0xff]  ;;  %s330_s20 = sshll.u32 %s451_s12, 4 }
   0xe   : > { %215 = vperm.xlu0 %357, %v212_v0   ;;  %s198_s23 = scalar_lea.vmem %s442_s0, %s330_s20  ;;  %s208_s26 = scalar_lea.vmem %s445_s3, %s330_s20 }
   0xf   : > { %v210_v4 = vld [vmem:[%s198_s23] sm:$0xff]  ;;  %v211_v5 = vld [vmem:[%s198_s23 + $0x8] sm:$0xff] }
  0x16   : > { %223 = vperm.xlu0 %357, %v220_v2  }
  0x80   : > { %v216_v3 = vpop.permute.xlu0 %215 }
  0x81   : > { %v218_v6 = vmul.f32 %v216_v3, %v210_v4  ;;  %v219_v7 = vmul.f32 %v216_v3, %v211_v5 }
  0x88   : > { %v224_v8 = vpop.permute.xlu0 %223 }
  0x89   : > { %v226_v9 = vadd.f32 %v224_v8, %v218_v6  ;;  %v227_v10 = vadd.f32 %v224_v8, %v219_v7 }
  0x8b   : > { %v228_v11 = vmax.f32 %v226_v9, 0.0  ;;  %v229_v12 = vmax.f32 %v227_v10, 0.0 }
  0x8d   : > { %230 = vst [vmem:[%s208_s26] sm:$0xff] %v228_v11 }
  0x8e   : > { %231 = vst [vmem:[%s208_s26 + $0x8] sm:$0xff] %v229_v12 }
  0x8f PF: > { %s13_s14 = sadd.s32 1, %s380_s14   ;;  %s446_s12 = smov %s376_s13 }
  0x90   : > { %p10_p5 = scmp.ge.s32.totalorder %s13_s14, 4   ;;  %s447_s13 = smov %s449_s15 }
  0x92   :  { %12 = sbr.rel (!%p10_p5) target bundleno = 2 (0x2), region = 62 }

// kernel: basic_convolution_block.2
= control target key start
LH: loop header
LB: loop body
LE: loop exit
PB: predicated region body
PF: predicated region fallthrough
CT: control target
= control target key end

     0   :  { %s747_s15 = smov 0   ;;  %s749_s16 = smov 0   ;;  %s828_s0 = inlined_call_operand.vmem [shape: bf16[2,128,256], index: 0, kind: input, shape index: {}]   ;;  %s829_s1 = inlined_call_operand.vmem [shape: bf16[8,128], index: 1, kind: input, shape index: {}]   ;;  %s830_s2 = inlined_call_operand.vmem [shape: f32[2,8,256], index: 2, kind: output, shape index: {0}]   ;;  %s831_s3 = inlined_call_operand.vmem [shape: f32[2,1,8,1], index: 3, kind: output, shape index: {1}]   ;;  %s832_s4 = inlined_call_operand.vmem [shape: f32[2,1,8,1], index: 4, kind: output, shape index: {2}]  }
   0x1   :  { %s751_s17 = smov 0  }
   0x2 LB: > { %s27_s18 = sadd.s32 1, %s716_s16  ;;  %p583_p0 = scmp.ge.s32.totalorder %s720_s17, 1  ;;  %s720_s17 = sphi %s751_s17, %s15_s17   ;;  %s716_s16 = sphi %s749_s16, %s834_s16   ;;  %s712_s15 = sphi %s747_s15, %s833_s15  }
   0x3   : > { %p29_p1 = scmp.ge.s32.totalorder %s27_s18, 2  ;;  %p192_p2 = scmp.lt.s32.totalorder %s720_s17, 3 }
   0x5   : > { %s836_s18 = smov (%p29_p1, %s27_s18), 0  ;;  %p193_p3 = pnand %p583_p0, %p192_p2 }
   0x6   : > { %p241_p4 = scmp.lt.s32.totalorder (!%p193_p3), %s712_s15, 1 }
   0x7   : > { %196 = sbr.rel (%p193_p3) target bundleno = 303 (0x12f), region = 28 }
   0xc   : > { %s838_s15 = smov (!%p241_p4, %s712_s15), 1  ;;  %v274_v48 = vld [vmem:[%s829_s1] sm:$0xf]  ;;  %vm402_vm0 = vcmask 7168  }
   0xd   : > { %s656_s19 = sshll.u32 %s838_s15, 7  ;;  %s657_s25 = sshll.u32 %s838_s15, 4 }
   0xe   : > { %s771_s22 = scalar_lea.vmem %s828_s0, %s656_s19  ;;  %s258_s28 = scalar_lea.vmem %s830_s2, %s657_s25 }
   0xf   : > { %v648_v0 = vld [vmem:[%s771_s22 + $0x70] sm:$0xf]  ;;  %v673_v1 = vld [vmem:[%s771_s22 + $0x74] sm:$0xf0]  ;;  %v672_v2 = vld [vmem:[%s771_s22 + $0x74] sm:$0xf] }
  0x10   : > { %v649_v3 = vor.u32 %v673_v1, %v648_v0  ;;  %v650_v4 = vld [vmem:[%s771_s22 + $0x78] sm:$0xf0]  ;;  %v640_v5 = vld [vmem:[%s771_s22 + $0x60] sm:$0xf]  ;;  %v671_v6 = vld [vmem:[%s771_s22 + $0x64] sm:$0xf0] }
  0x11   : > { %v653_v7 = vor.u32 %v672_v2, %v650_v4  ;;  %v670_v8 = vld [vmem:[%s771_s22 + $0x64] sm:$0xf]  ;;  %v642_v9 = vld [vmem:[%s771_s22 + $0x68] sm:$0xf0]  ;;  %v641_v10 = vor.u32 %v671_v6, %v640_v5  ;;  %v632_v12 = vld [vmem:[%s771_s22 + $0x50] sm:$0xf] }
  0x12   : > { %371 = vmatpush.bf16.msra.mxu0 %v649_v3  ;;  %v645_v11 = vor.u32 %v670_v8, %v642_v9  ;;  %v669_v13 = vld [vmem:[%s771_s22 + $0x54] sm:$0xf0]  ;;  %v668_v14 = vld [vmem:[%s771_s22 + $0x54] sm:$0xf]  ;;  %v634_v15 = vld [vmem:[%s771_s22 + $0x58] sm:$0xf0] }
  0x13   : > { %384 = vmatpush.bf16.msra.mxu1 %v653_v7  ;;  %v633_v16 = vor.u32 %v669_v13, %v632_v12  ;;  %v637_v17 = vor.u32 %v668_v14, %v634_v15  ;;  %v624_v18 = vld [vmem:[%s771_s22 + $0x40] sm:$0xf]  ;;  %v667_v19 = vld [vmem:[%s771_s22 + $0x44] sm:$0xf0]  ;;  %v666_v20 = vld [vmem:[%s771_s22 + $0x44] sm:$0xf] }
  0x14   : > { %v626_v21 = vld [vmem:[%s771_s22 + $0x48] sm:$0xf0]  ;;  %v625_v22 = vor.u32 %v667_v19, %v624_v18  ;;  %v616_v24 = vld [vmem:[%s771_s22 + $0x30] sm:$0xf]  ;;  %v665_v25 = vld [vmem:[%s771_s22 + $0x34] sm:$0xf0] }
  0x15   : > { %v629_v23 = vor.u32 %v666_v20, %v626_v21  ;;  %v664_v26 = vld [vmem:[%s771_s22 + $0x34] sm:$0xf]  ;;  %v618_v27 = vld [vmem:[%s771_s22 + $0x38] sm:$0xf0]  ;;  %v617_v28 = vor.u32 %v665_v25, %v616_v24  ;;  %v608_v30 = vld [vmem:[%s771_s22 + $0x20] sm:$0xf] }
  0x16   : > { %372 = vmatpush.bf16.msra.mxu0 %v641_v10  ;;  %v621_v29 = vor.u32 %v664_v26, %v618_v27  ;;  %v663_v31 = vld [vmem:[%s771_s22 + $0x24] sm:$0xf0]  ;;  %v662_v32 = vld [vmem:[%s771_s22 + $0x24] sm:$0xf]  ;;  %v610_v33 = vld [vmem:[%s771_s22 + $0x28] sm:$0xf0] }
  0x17   : > { %385 = vmatpush.bf16.msra.mxu1 %v645_v11  ;;  %v609_v34 = vor.u32 %v663_v31, %v608_v30  ;;  %v613_v35 = vor.u32 %v662_v32, %v610_v33  ;;  %v600_v36 = vld [vmem:[%s771_s22 + $0x10] sm:$0xf]  ;;  %v661_v37 = vld [vmem:[%s771_s22 + $0x14] sm:$0xf0]  ;;  %v660_v38 = vld [vmem:[%s771_s22 + $0x14] sm:$0xf] }
  0x18   : > { %v602_v39 = vld [vmem:[%s771_s22 + $0x18] sm:$0xf0]  ;;  %v601_v40 = vor.u32 %v661_v37, %v600_v36  ;;  %v592_v42 = vld [vmem:[%s771_s22] sm:$0xf]  ;;  %v659_v43 = vld [vmem:[%s771_s22 + $0x4] sm:$0xf0] }
  0x19   : > { %v605_v41 = vor.u32 %v660_v38, %v602_v39  ;;  %v658_v44 = vld [vmem:[%s771_s22 + $0x4] sm:$0xf]  ;;  %v594_v45 = vld [vmem:[%s771_s22 + $0x8] sm:$0xf0]  ;;  %v593_v46 = vor.u32 %v659_v43, %v592_v42  ;;  %s588_s29 = sshll.u32 %s838_s15, 3 }
  0x1a   : > { %373 = vmatpush.bf16.msra.mxu0 %v633_v16  ;;  %v597_v47 = vor.u32 %v658_v44, %v594_v45  ;;  %s266_s6 = scalar_lea.vmem %s831_s3, %s588_s29  ;;  %s273_s9 = scalar_lea.vmem %s832_s4, %s588_s29 }
  0x1b   : > { %386 = vmatpush.bf16.msra.mxu1 %v637_v17 }
  0x1e   : > { %374 = vmatpush.bf16.msra.mxu0 %v625_v22 }
  0x1f   : > { %387 = vmatpush.bf16.msra.mxu1 %v629_v23 }
  0x22   : > { %375 = vmatpush.bf16.msra.mxu0 %v617_v28 }
  0x23   : > { %388 = vmatpush.bf16.msra.mxu1 %v621_v29 }
  0x26   : > { %376 = vmatpush.bf16.msra.mxu0 %v609_v34 }
  0x27   : > { %389 = vmatpush.bf16.msra.mxu1 %v613_v35 }
  0x2a   : > { %377 = vmatpush.bf16.msra.mxu0 %v601_v40 }
  0x2b   : > { %390 = vmatpush.bf16.msra.mxu1 %v605_v41 }
  0x2e   : > { %378 = vmatpush.bf16.msra.mxu0 %v593_v46 }
  0x2f   : > { %391 = vmatpush.bf16.msra.mxu1 %v597_v47 }
  0x31   : > { %379 = vmatmul.bf16.vlgmr.msra.gmra.mxu0 %v274_v48 }
  0x32   : > { %392 = vmatmul.bf16.vlgmr.msra.gmra.mxu1 %v274_v48 }
  0xae   : > { %v380_v49 = vpop.f32.mrf.mxu0 }
  0xaf   : > { %397 = vst [vmem:[%s258_s28] sm:$0xff] %v380_v49  ;;  %v393_v50 = vpop.f32.mrf.mxu1  ;;  %v404_v52 = vmul.f32 %v380_v49, %v380_v49 }
  0xb0   : > { %398 = vst [vmem:[%s258_s28 + $0x8] sm:$0xff] %v393_v50  ;;  %v399_v51 = vadd.f32 %v393_v50, %v380_v49  ;;  %v405_v53 = vmul.f32 %v393_v50, %v393_v50 }
  0xb2   : > { %400 = vadd.xlane.f32.xlu0 %v399_v51  ;;  %v406_v56 = vadd.f32 %v405_v53, %v404_v52 }
  0xb6   : > { %v382_v54 = vpop.f32.mrf.mxu0 }
  0xb7   : > { %v395_v55 = vpop.f32.mrf.mxu1 }
  0xba   : > { %407 = vadd.xlane.f32.xlu0 %v406_v56 }
 0x125   : > { %v401_v57 = vpop.xlane.xlu0 %400 }
 0x126   : > { %403 = vst.msk [vmem:[%s266_s6] sm:$0xff] %vm402_vm0, %v401_v57 }
 0x12d   : > { %v408_v58 = vpop.xlane.xlu0 %407 }
 0x12e   : > { %409 = vst.msk [vmem:[%s273_s9] sm:$0xff] %vm402_vm0, %v408_v58 }
 0x12f PF: > { %s15_s17 = sadd.s32 1, %s720_s17   ;;  %s833_s15 = smov %s716_s16 }
 0x130   : > { %p12_p5 = scmp.ge.s32.totalorder %s15_s17, 4   ;;  %s834_s16 = smov %s836_s18 }
 0x132   :  { %14 = sbr.rel (!%p12_p5) target bundleno = 2 (0x2), region = 82 }

</bundles_post_ra>
